<compile_context>
chip_gen: v7x
topology: tpu7x:2x2x1
jax: 0.10.0
libtpu: 0.0.40
codegen_flags: <defaults>
</compile_context>

<pallas_src>
import jax
import jax.numpy as jnp
from jax.experimental import pallas as pl
from jax.experimental.pallas import tpu as pltpu


def _affine_kernel(x_ref, w_ref, b_ref, o_ref):
    # x_ref: (TB, D) VMEM tile of the batch (double-buffered by Pallas)
    # w_ref: (D, 1)  VMEM, resident across all grid steps (constant index_map)
    # b_ref: (1,)    SMEM scalar
    # o_ref: (TB, 1) VMEM output tile
    y = jnp.dot(x_ref[...], w_ref[...], preferred_element_type=jnp.float32)
    o_ref[...] = (y + b_ref[0]).astype(o_ref.dtype)


def fold_affine_params(params):
    """Fold the 5 Linear layers (+ identity Dropouts) into one affine map.

    params: list of (W [in, out], b [1, out]) f32 pairs, PyTorch-equivalent
            layout so that layer(x) == x @ W + b.
    Returns (W_eff [input_size, 1] f32, b_eff [1] f32).  Exact (same map) for
    an inference-mode linear stack; done once at parameter-load time.
    """
    w_eff, b_eff = params[0]
    for w, b in params[1:]:
        b_eff = b_eff @ w + b
        w_eff = w_eff @ w
    return w_eff, b_eff.reshape(-1)


def mlp_forward(x, w_eff, b_eff, *, block_b=512):
    """x: [B, input_size] f32, w_eff: [input_size, 1] f32, b_eff: [1] f32."""
    B, D = x.shape
    tb = min(block_b, B)
    grid = (pl.cdiv(B, tb),)

    cost = pl.CostEstimate(
        flops=2 * B * D,
        transcendentals=0,
        bytes_accessed=int(x.size * x.dtype.itemsize
                           + w_eff.size * w_eff.dtype.itemsize
                           + B * 4),
    )

    return pl.pallas_call(
        _affine_kernel,
        out_shape=jax.ShapeDtypeStruct((B, 1), jnp.float32),
        grid=grid,
        in_specs=[
            # Batch tile of x, streamed + double-buffered.
            pl.BlockSpec((tb, D), lambda i: (i, 0)),
            # Folded weight: same block every step -> DMA'd once, stays resident.
            pl.BlockSpec((D, 1), lambda i: (0, 0)),
            # Folded bias: single scalar in SMEM.
            pl.BlockSpec(memory_space=pltpu.MemorySpace.SMEM),
        ],
        out_specs=pl.BlockSpec((tb, 1), lambda i: (i, 0)),
        compiler_params=pltpu.CompilerParams(
            dimension_semantics=("parallel",)),
        cost_estimate=cost,
    )(x, w_eff, b_eff)


def init_params(key, input_size):
    """Deterministic init of the 5 Linear layers (PyTorch-default uniform)."""
    sizes = [(input_size, 1024), (1024, 128), (128, 64), (64, 16), (16, 1)]
    params = []
    for i, (fan_in, fan_out) in enumerate(sizes):
        kw, kb = jax.random.split(jax.random.fold_in(key, i))
        scale = 1.0 / jnp.sqrt(jnp.float32(fan_in))
        w = jax.random.uniform(kw, (fan_in, fan_out), jnp.float32, -scale, scale)
        b = jax.random.uniform(kb, (1, fan_out), jnp.float32, -scale, scale)
        params.append((w, b))
    return params


def mlp_reference(x, params):
    """Layer-by-layer reference (Dropout = identity in eval mode)."""
    h = x
    for w, b in params:
        h = h @ w + b
    return h


if __name__ == "__main__":
    key = jax.random.PRNGKey(0)
    B = 8
    INPUT_SIZE = 768  # CLIP ViT-L/14 embedding dim used by the aesthetic MLP

    kx, kp = jax.random.split(key)
    x = jax.random.normal(kx, (B, INPUT_SIZE), jnp.float32)
    params = init_params(kp, INPUT_SIZE)

    # One-time parameter preparation (affine fold of the 5-layer stack).
    w_eff, b_eff = fold_affine_params(params)

    out = mlp_forward(x, w_eff, b_eff)
    out = jax.block_until_ready(out)

    ref = mlp_reference(x, params)
    assert out.shape == (B, 1), out.shape
    assert jnp.allclose(out, ref, atol=1e-3, rtol=1e-3), "mismatch vs reference"

    print("KERNEL_OK")
</pallas_src>

<mosaic_0001>
module attributes {stable_mosaic.version = 11 : i64} {
  func.func @_affine_kernel(%arg0: i32, %arg1: memref<8x768xf32, #tpu.memory_space<vmem>>, %arg2: memref<768x1xf32, #tpu.memory_space<vmem>>, %arg3: memref<1xf32, #tpu.memory_space<smem>>, %arg4: memref<8x1xf32, #tpu.memory_space<vmem>>) attributes {dimension_semantics = [#tpu.dimension_semantics<parallel>], iteration_bounds = array<i64: 1>, scalar_prefetch = 0 : i64, scratch_operands = 0 : i64, tpu.core_type = #tpu.core_type<tc>, window_params = [{transform_indices = @transform_0, window_bounds = array<i64: 8, 768>}, {pipeline_mode = #tpu.pipeline_mode<synchronous>, transform_indices = @transform_1, window_bounds = array<i64: 768, 1>}, {transform_indices = @transform_2, window_bounds = array<i64: 1>}, {transform_indices = @transform_3, window_bounds = array<i64: 8, 1>}]} {
    %c0 = arith.constant 0 : index
    %c0_0 = arith.constant 0 : index
    %0 = vector.load %arg1[%c0, %c0_0] : memref<8x768xf32, #tpu.memory_space<vmem>>, vector<8x768xf32>
    %c0_1 = arith.constant 0 : index
    %c0_2 = arith.constant 0 : index
    %1 = vector.load %arg2[%c0_1, %c0_2] : memref<768x1xf32, #tpu.memory_space<vmem>>, vector<768x1xf32>
    %cst = arith.constant dense<0.000000e+00> : vector<8x1xf32>
    %2 = tpu.matmul %0, %1, %cst {dimension_numbers = #tpu.dot_dimension_numbers<[1], [0], [0], [1], [0, 0, 1, 1], [], []>} : vector<8x768xf32>, vector<768x1xf32>, vector<8x1xf32> -> vector<8x1xf32>
    %c0_3 = arith.constant 0 : index
    %3 = memref.load %arg3[%c0_3] : memref<1xf32, #tpu.memory_space<smem>>
    %4 = vector.broadcast %3 : f32 to vector<8x1xf32>
    %5 = arith.addf %2, %4 : vector<8x1xf32>
    %c0_4 = arith.constant 0 : index
    %c0_5 = arith.constant 0 : index
    %6 = vector.load %arg4[%c0_4, %c0_5] : memref<8x1xf32, #tpu.memory_space<vmem>>, vector<8x1xf32>
    tpu.vector_store %arg4[%c0_4, %c0_5], %5 {strides = array<i32>} : memref<8x1xf32, #tpu.memory_space<vmem>>, vector<8x1xf32>,
    return
  }
  func.func @transform_0(%arg0: i32) -> (i32, i32) {
    %c0_i32 = arith.constant 0 : i32
    %c0_i32_0 = arith.constant 0 : i32
    return %arg0, %c0_i32 : i32, i32
  }
  func.func @transform_1(%arg0: i32) -> (i32, i32) {
    %c0_i32 = arith.constant 0 : i32
    %c0_i32_0 = arith.constant 0 : i32
    %c0_i32_1 = arith.constant 0 : i32
    return %c0_i32, %c0_i32_0 : i32, i32
  }
  func.func @transform_2(%arg0: i32) -> i32 {
    %c0_i32 = arith.constant 0 : i32
    %c0_i32_0 = arith.constant 0 : i32
    return %c0_i32 : i32
  }
  func.func @transform_3(%arg0: i32) -> (i32, i32) {
    %c0_i32 = arith.constant 0 : i32
    %c0_i32_0 = arith.constant 0 : i32
    return %arg0, %c0_i32 : i32, i32
  }
}

</mosaic_0001>

<bundles_post_ra>
// kernel: tpu_custom_call.1
= control target key start
LH: loop header
LB: loop body
LE: loop exit
PB: predicated region body
PF: predicated region fallthrough
CT: control target
= control target key end

     0   :  { %vm329_vm0 = vcmask 7168   ;;  %s868_s1 = inlined_call_operand.vmem [shape: f32[768,1], index: 1, kind: input, shape index: {}]   ;;  %s869_s0 = inlined_call_operand.vmem [shape: f32[8,768], index: 0, kind: input, shape index: {}]   ;;  %s870_s2 = inlined_call_operand.<no memory space> [shape: f32[1], index: 2, kind: input, shape index: {}]   ;;  %s871_s3 = inlined_call_operand.vmem [shape: f32[8,1], index: 3, kind: output, shape index: {}]  }
   0x1   :  { %v37_v0 = vld [vmem:[%s868_s1 + $0x80] sm:$0xff]  ;;  %v38_v1 = vld [vmem:[%s868_s1 + $0x88] sm:$0xff]  ;;  %v39_v11 = vld [vmem:[%s868_s1 + $0x90] sm:$0xff] }
   0x2   :  { %v21_v2 = vld [vmem:[%s868_s1] sm:$0xff]  ;;  %v440_v3 = vpack.c.bf16 %v38_v1, %v37_v0  ;;  %v22_v4 = vld [vmem:[%s868_s1 + $0x8] sm:$0xff]  ;;  %v40_v13 = vld [vmem:[%s868_s1 + $0x98] sm:$0xff] }
   0x3   :  { %v69_v5 = vld [vmem:[%s868_s1 + $0x180] sm:$0xff]  ;;  %v70_v6 = vld [vmem:[%s868_s1 + $0x188] sm:$0xff]  ;;  %v442_v7 = vpack.c.bf16 %v22_v4, %v21_v2  ;;  %v23_v14 = vld [vmem:[%s868_s1 + $0x10] sm:$0xff]  ;;  %v444_v16 = vpack.c.bf16 %v40_v13, %v39_v11 }
   0x4   :  { %v472_v8 = vpack.c.bf16 %v70_v6, %v69_v5  ;;  %v53_v9 = vld [vmem:[%s868_s1 + $0x100] sm:$0xff]  ;;  %v54_v10 = vld [vmem:[%s868_s1 + $0x108] sm:$0xff]  ;;  %441 = vmatprep.subr.bf16.mxu0 %v440_v3  ;;  %v24_v15 = vld [vmem:[%s868_s1 + $0x18] sm:$0xff] }
   0x5   :  { %v474_v12 = vpack.c.bf16 %v54_v10, %v53_v9  ;;  %443 = vmatpush3.bf16.msra.mxu0 %v442_v7  ;;  %v446_v17 = vpack.c.bf16 %v24_v15, %v23_v14  ;;  %v71_v18 = vld [vmem:[%s868_s1 + $0x190] sm:$0xff]  ;;  %v72_v19 = vld [vmem:[%s868_s1 + $0x198] sm:$0xff]  ;;  %v41_v23 = vld [vmem:[%s868_s1 + $0xa0] sm:$0xff] }
   0x6   :  { %473 = vmatprep.subr.bf16.mxu1 %v472_v8  ;;  %v55_v20 = vld [vmem:[%s868_s1 + $0x110] sm:$0xff]  ;;  %v476_v21 = vpack.c.bf16 %v72_v19, %v71_v18  ;;  %v56_v22 = vld [vmem:[%s868_s1 + $0x118] sm:$0xff]  ;;  %v42_v24 = vld [vmem:[%s868_s1 + $0xa8] sm:$0xff]  ;;  %445 = vmatprep.subr.bf16.mxu0 %v444_v16 }
   0x7   :  { %475 = vmatpush3.bf16.msra.mxu1 %v474_v12  ;;  %v478_v25 = vpack.c.bf16 %v56_v22, %v55_v20  ;;  %v448_v26 = vpack.c.bf16 %v42_v24, %v41_v23  ;;  %v25_v27 = vld [vmem:[%s868_s1 + $0x20] sm:$0xff]  ;;  %v26_v28 = vld [vmem:[%s868_s1 + $0x28] sm:$0xff]  ;;  %v43_v35 = vld [vmem:[%s868_s1 + $0xb0] sm:$0xff] }
   0x8   :  { %v73_v29 = vld [vmem:[%s868_s1 + $0x1a0] sm:$0xff]  ;;  %477 = vmatprep.subr.bf16.mxu1 %v476_v21  ;;  %v74_v30 = vld [vmem:[%s868_s1 + $0x1a8] sm:$0xff]  ;;  %v450_v33 = vpack.c.bf16 %v26_v28, %v25_v27  ;;  %v44_v36 = vld [vmem:[%s868_s1 + $0xb8] sm:$0xff] }
   0x9   :  { %v57_v31 = vld [vmem:[%s868_s1 + $0x120] sm:$0xff]  ;;  %v58_v32 = vld [vmem:[%s868_s1 + $0x128] sm:$0xff]  ;;  %447 = vmatpush3.bf16.msra.mxu0 %v446_v17  ;;  %v480_v34 = vpack.c.bf16 %v74_v30, %v73_v29  ;;  %v27_v37 = vld [vmem:[%s868_s1 + $0x30] sm:$0xff]  ;;  %v452_v39 = vpack.c.bf16 %v44_v36, %v43_v35 }
   0xa   :  { %449 = vmatprep.subr.bf16.mxu0 %v448_v26  ;;  %v482_v38 = vpack.c.bf16 %v58_v32, %v57_v31  ;;  %v28_v40 = vld [vmem:[%s868_s1 + $0x38] sm:$0xff]  ;;  %v75_v41 = vld [vmem:[%s868_s1 + $0x1b0] sm:$0xff]  ;;  %v45_v46 = vld [vmem:[%s868_s1 + $0xc0] sm:$0xff] }
   0xb   :  { %479 = vmatpush3.bf16.msra.mxu1 %v478_v25  ;;  %v76_v42 = vld [vmem:[%s868_s1 + $0x1b8] sm:$0xff]  ;;  %v59_v44 = vld [vmem:[%s868_s1 + $0x130] sm:$0xff]  ;;  %v46_v47 = vld [vmem:[%s868_s1 + $0xc8] sm:$0xff]  ;;  %v454_v48 = vpack.c.bf16 %v28_v40, %v27_v37 }
   0xc   :  { %481 = vmatprep.subr.bf16.mxu1 %v480_v34  ;;  %v484_v43 = vpack.c.bf16 %v76_v42, %v75_v41  ;;  %v60_v45 = vld [vmem:[%s868_s1 + $0x138] sm:$0xff]  ;;  %v77_v49 = vld [vmem:[%s868_s1 + $0x1c0] sm:$0xff]  ;;  %v78_v50 = vld [vmem:[%s868_s1 + $0x1c8] sm:$0xff]  ;;  %v456_v52 = vpack.c.bf16 %v46_v47, %v45_v46 }
   0xd   :  { %451 = vmatpush3.bf16.msra.mxu0 %v450_v33  ;;  %v486_v51 = vpack.c.bf16 %v60_v45, %v59_v44  ;;  %v29_v53 = vld [vmem:[%s868_s1 + $0x40] sm:$0xff]  ;;  %v30_v54 = vld [vmem:[%s868_s1 + $0x48] sm:$0xff]  ;;  %v488_v56 = vpack.c.bf16 %v78_v50, %v77_v49  ;;  %v47_v58 = vld [vmem:[%s868_s1 + $0xd0] sm:$0xff] }
   0xe   :  { %453 = vmatprep.subr.bf16.mxu0 %v452_v39  ;;  %v61_v55 = vld [vmem:[%s868_s1 + $0x140] sm:$0xff]  ;;  %v62_v57 = vld [vmem:[%s868_s1 + $0x148] sm:$0xff]  ;;  %v48_v59 = vld [vmem:[%s868_s1 + $0xd8] sm:$0xff]  ;;  %v458_v62 = vpack.c.bf16 %v30_v54, %v29_v53 }
   0xf   :  { %483 = vmatpush3.bf16.msra.mxu1 %v482_v38  ;;  %v79_v60 = vld [vmem:[%s868_s1 + $0x1d0] sm:$0xff]  ;;  %v80_v61 = vld [vmem:[%s868_s1 + $0x1d8] sm:$0xff]  ;;  %v490_v63 = vpack.c.bf16 %v62_v57, %v61_v55  ;;  %v460_v0 = vpack.c.bf16 %v48_v59, %v47_v58  ;;  %v49_v6 = vld [vmem:[%s868_s1 + $0xe0] sm:$0xff] }
  0x10   :  { %485 = vmatprep.subr.bf16.mxu1 %v484_v43  ;;  %v31_v1 = vld [vmem:[%s868_s1 + $0x50] sm:$0xff]  ;;  %v32_v2 = vld [vmem:[%s868_s1 + $0x58] sm:$0xff]  ;;  %v492_v4 = vpack.c.bf16 %v80_v61, %v79_v60  ;;  %v50_v7 = vld [vmem:[%s868_s1 + $0xe8] sm:$0xff] }
  0x11   :  { %455 = vmatpush3.bf16.msra.mxu0 %v454_v48  ;;  %v63_v3 = vld [vmem:[%s868_s1 + $0x150] sm:$0xff]  ;;  %v64_v5 = vld [vmem:[%s868_s1 + $0x158] sm:$0xff]  ;;  %v81_v8 = vld [vmem:[%s868_s1 + $0x1e0] sm:$0xff]  ;;  %v462_v10 = vpack.c.bf16 %v32_v2, %v31_v1  ;;  %v464_v14 = vpack.c.bf16 %v50_v7, %v49_v6 }
  0x12   :  { %457 = vmatprep.subr.bf16.mxu0 %v456_v52  ;;  %v82_v9 = vld [vmem:[%s868_s1 + $0x1e8] sm:$0xff]  ;;  %v33_v11 = vld [vmem:[%s868_s1 + $0x60] sm:$0xff]  ;;  %v494_v13 = vpack.c.bf16 %v64_v5, %v63_v3  ;;  %v51_v19 = vld [vmem:[%s868_s1 + $0xf0] sm:$0xff] }
  0x13   :  { %487 = vmatpush3.bf16.msra.mxu1 %v486_v51  ;;  %v16_v12 = vld [vmem:[%s869_s0 + $0x8] sm:$0xff]  ;;  %v65_v16 = vld [vmem:[%s868_s1 + $0x160] sm:$0xff]  ;;  %v496_v18 = vpack.c.bf16 %v82_v9, %v81_v8  ;;  %v52_v20 = vld [vmem:[%s868_s1 + $0xf8] sm:$0xff] }
  0x14   :  { %489 = vmatprep.subr.bf16.mxu1 %v488_v56  ;;  %v34_v15 = vld [vmem:[%s868_s1 + $0x68] sm:$0xff]  ;;  %183 = vmatprep.mubr.f32.mxu0 %v16_v12  ;;  %v18_v21 = vld [vmem:[%s869_s0 + $0x18] sm:$0xff]  ;;  %v83_v22 = vld [vmem:[%s868_s1 + $0x1f0] sm:$0xff]  ;;  %v468_v26 = vpack.c.bf16 %v52_v20, %v51_v19 }
  0x15   :  { %459 = vmatpush3.bf16.msra.mxu0 %v458_v62  ;;  %v66_v17 = vld [vmem:[%s868_s1 + $0x168] sm:$0xff]  ;;  %v84_v23 = vld [vmem:[%s868_s1 + $0x1f8] sm:$0xff]  ;;  %253 = vmatprep.mubr.f32.mxu1 %v18_v21  ;;  %v466_v24 = vpack.c.bf16 %v34_v15, %v33_v11  ;;  %v35_v27 = vld [vmem:[%s868_s1 + $0x70] sm:$0xff] }
  0x16   :  { %461 = vmatprep.subr.bf16.mxu0 %v460_v0  ;;  %v498_v25 = vpack.c.bf16 %v66_v17, %v65_v16  ;;  %v36_v28 = vld [vmem:[%s868_s1 + $0x78] sm:$0xff]  ;;  %v67_v29 = vld [vmem:[%s868_s1 + $0x170] sm:$0xff]  ;;  %v500_v30 = vpack.c.bf16 %v84_v23, %v83_v22  ;;  %v101_v32 = vld [vmem:[%s868_s1 + $0x280] sm:$0xff]  ;;  %v118_v23 = vstv %s870_s2 }
  0x17   :  { %491 = vmatpush3.bf16.msra.mxu1 %v490_v63  ;;  %v68_v31 = vld [vmem:[%s868_s1 + $0x178] sm:$0xff]  ;;  %v102_v33 = vld [vmem:[%s868_s1 + $0x288] sm:$0xff]  ;;  %v470_v34 = vpack.c.bf16 %v36_v28, %v35_v27  ;;  %v85_v37 = vld [vmem:[%s868_s1 + $0x200] sm:$0xff] }
  0x18   :  { %493 = vmatprep.subr.bf16.mxu1 %v492_v4  ;;  %v502_v35 = vpack.c.bf16 %v68_v31, %v67_v29  ;;  %v504_v36 = vpack.c.bf16 %v102_v33, %v101_v32  ;;  %v86_v38 = vld [vmem:[%s868_s1 + $0x208] sm:$0xff]  ;;  %v103_v39 = vld [vmem:[%s868_s1 + $0x290] sm:$0xff]  ;;  %v104_v40 = vld [vmem:[%s868_s1 + $0x298] sm:$0xff] }
  0x19   :  { %463 = vmatpush3.bf16.msra.mxu0 %v462_v10  ;;  %v15_v41 = vld [vmem:[%s869_s0] sm:$0xff]  ;;  %v506_v42 = vpack.c.bf16 %v86_v38, %v85_v37  ;;  %v17_v43 = vld [vmem:[%s869_s0 + $0x10] sm:$0xff]  ;;  %v508_v44 = vpack.c.bf16 %v104_v40, %v103_v39  ;;  %v88_v46 = vld [vmem:[%s868_s1 + $0x218] sm:$0xff] }
  0x1a   :  { %465 = vmatprep.subr.bf16.mxu0 %v464_v14  ;;  %v87_v45 = vld [vmem:[%s868_s1 + $0x210] sm:$0xff]  ;;  %v105_v47 = vld [vmem:[%s868_s1 + $0x2a0] sm:$0xff]  ;;  %v106_v48 = vld [vmem:[%s868_s1 + $0x2a8] sm:$0xff] }
  0x1b   :  { %495 = vmatpush3.bf16.msra.mxu1 %v494_v13  ;;  %v20_v49 = vld [vmem:[%s869_s0 + $0x28] sm:$0xff]  ;;  %v510_v50 = vpack.c.bf16 %v88_v46, %v87_v45  ;;  %v512_v51 = vpack.c.bf16 %v106_v48, %v105_v47  ;;  %v89_v52 = vld [vmem:[%s868_s1 + $0x220] sm:$0xff]  ;;  %v107_v54 = vld [vmem:[%s868_s1 + $0x2b0] sm:$0xff] }
  0x1c   :  { %497 = vmatprep.subr.bf16.mxu1 %v496_v18  ;;  %v90_v53 = vld [vmem:[%s868_s1 + $0x228] sm:$0xff]  ;;  %v108_v55 = vld [vmem:[%s868_s1 + $0x2b8] sm:$0xff]  ;;  %v91_v58 = vld [vmem:[%s868_s1 + $0x230] sm:$0xff] }
  0x1d   :  { %467 = vmatpush3.bf16.msra.mxu0 %v466_v24  ;;  %v514_v56 = vpack.c.bf16 %v90_v53, %v89_v52  ;;  %v516_v57 = vpack.c.bf16 %v108_v55, %v107_v54  ;;  %v92_v59 = vld [vmem:[%s868_s1 + $0x238] sm:$0xff]  ;;  %v109_v60 = vld [vmem:[%s868_s1 + $0x2c0] sm:$0xff]  ;;  %v110_v61 = vld [vmem:[%s868_s1 + $0x2c8] sm:$0xff] }
  0x1e   :  { %469 = vmatprep.subr.bf16.mxu0 %v468_v26  ;;  %v518_v62 = vpack.c.bf16 %v92_v59, %v91_v58  ;;  %v520_v63 = vpack.c.bf16 %v110_v61, %v109_v60  ;;  %v93_v0 = vld [vmem:[%s868_s1 + $0x240] sm:$0xff]  ;;  %v94_v1 = vld [vmem:[%s868_s1 + $0x248] sm:$0xff]  ;;  %v111_v2 = vld [vmem:[%s868_s1 + $0x2d0] sm:$0xff] }
  0x1f   :  { %499 = vmatpush3.bf16.msra.mxu1 %v498_v25  ;;  %v112_v3 = vld [vmem:[%s868_s1 + $0x2d8] sm:$0xff]  ;;  %v522_v4 = vpack.c.bf16 %v94_v1, %v93_v0  ;;  %v95_v6 = vld [vmem:[%s868_s1 + $0x250] sm:$0xff]  ;;  %v113_v8 = vld [vmem:[%s868_s1 + $0x2e0] sm:$0xff] }
  0x20   :  { %501 = vmatprep.subr.bf16.mxu1 %v500_v30  ;;  %v524_v5 = vpack.c.bf16 %v112_v3, %v111_v2  ;;  %v96_v7 = vld [vmem:[%s868_s1 + $0x258] sm:$0xff]  ;;  %v114_v9 = vld [vmem:[%s868_s1 + $0x2e8] sm:$0xff]  ;;  %v97_v12 = vld [vmem:[%s868_s1 + $0x260] sm:$0xff] }
  0x21   :  { %471 = vmatpush3.bf16.msra.mxu0 %v470_v34  ;;  %v526_v10 = vpack.c.bf16 %v96_v7, %v95_v6  ;;  %v528_v11 = vpack.c.bf16 %v114_v9, %v113_v8  ;;  %v98_v13 = vld [vmem:[%s868_s1 + $0x268] sm:$0xff]  ;;  %v115_v14 = vld [vmem:[%s868_s1 + $0x2f0] sm:$0xff]  ;;  %v116_v15 = vld [vmem:[%s868_s1 + $0x2f8] sm:$0xff] }
  0x22   :  { %505 = vmatprep.subr.bf16.mxu0 %v504_v36  ;;  %v530_v16 = vpack.c.bf16 %v98_v13, %v97_v12  ;;  %v532_v17 = vpack.c.bf16 %v116_v15, %v115_v14  ;;  %v99_v18 = vld [vmem:[%s868_s1 + $0x270] sm:$0xff]  ;;  %v100_v19 = vld [vmem:[%s868_s1 + $0x278] sm:$0xff]  ;;  %v19_v21 = vld [vmem:[%s869_s0 + $0x20] sm:$0xff] }
  0x23   :  { %503 = vmatpush3.bf16.msra.mxu1 %v502_v35  ;;  %v534_v20 = vpack.c.bf16 %v100_v19, %v99_v18 }
  0x24   :  { %184 = vmatmul.mubr.f32.vlgmr.msra.gmra.mrb[0].mxu0 %v15_v41 }
  0x25   :  { %507 = vmatpush3.bf16.msra.mxu0 %v506_v42  ;;  %323 = vmatprep.mubr.f32.mxu0 %v20_v49 }
  0x26   :  { %254 = vmatmul.mubr.f32.vlgmr.msra.gmra.mrb[0].mxu1 %v17_v43  ;;  %509 = vmatprep.subr.bf16.mxu0 %v508_v44 }
  0x29   :  { %511 = vmatpush3.bf16.msra.mxu0 %v510_v50 }
  0x2a   :  { %513 = vmatprep.subr.bf16.mxu0 %v512_v51 }
  0x2d   :  { %515 = vmatpush3.bf16.msra.mxu0 %v514_v56 }
  0x2e   :  { %517 = vmatprep.subr.bf16.mxu0 %v516_v57 }
  0x31   :  { %519 = vmatpush3.bf16.msra.mxu0 %v518_v62 }
  0x32   :  { %521 = vmatprep.subr.bf16.mxu0 %v520_v63 }
  0x35   :  { %523 = vmatpush3.bf16.msra.mxu0 %v522_v4 }
  0x36   :  { %525 = vmatprep.subr.bf16.mxu0 %v524_v5 }
  0x39   :  { %527 = vmatpush3.bf16.msra.mxu0 %v526_v10 }
  0x3a   :  { %529 = vmatprep.subr.bf16.mxu0 %v528_v11 }
  0x3d   :  { %531 = vmatpush3.bf16.msra.mxu0 %v530_v16 }
  0x3e   :  { %533 = vmatprep.subr.bf16.mxu0 %v532_v17 }
  0x41   :  { %535 = vmatpush3.bf16.msra.mxu0 %v534_v20 }
  0x44   :  { %324 = vmatmul.mubr.f32.vlgmr.msra.gmra.mrb[2].mxu0 %v19_v21 }
  0xf7   :  { %v367_v22 = vpop.f32.mrb[0].mxu0 }
  0xf8   :  { %v368_v24 = vpop.f32.mrb[1].mxu0 }
  0xf9   :  { %v402_v25 = vpop.f32.mrb[0].mxu1  ;;  %v369_v26 = vadd.f32 %v368_v24, %v367_v22 }
  0xfa   :  { %v403_v27 = vpop.f32.mrb[1].mxu1 }
  0xfb   :  { %v404_v28 = vadd.f32 %v403_v27, %v402_v25  ;;  %v186_v29 = vadd.f32 %v369_v26, %v118_v23 }
  0xfd   :  { %v256_v30 = vadd.f32 %v404_v28, %v186_v29 }
 0x117   :  { %v437_v31 = vpop.f32.mrb[2].mxu0 }
 0x118   :  { %v438_v32 = vpop.f32.mrb[3].mxu0 }
 0x119   :  { %v439_v33 = vadd.f32 %v438_v32, %v437_v31 }
 0x11b   :  { %v326_v34 = vadd.f32 %v439_v33, %v256_v30 }
 0x11d   :  { %330 = vst.msk [vmem:[%s871_s3] sm:$0xff] %vm329_vm0, %v326_v34 }

</bundles_post_ra>
